<compile_context>
chip_gen: v6e
topology: v6e:2x2x1
jax: 0.10.0
libtpu: 0.0.40
codegen_flags: <defaults>
</compile_context>

<pallas_src>
import functools
import math

import jax
import jax.numpy as jnp
from jax import lax
from jax.experimental import pallas as pl
from jax.experimental.pallas import tpu as pltpu

_LANE = 128
_BLOCK_BYTES = 4 * 1024 * 1024     # per input per grid step (double-buffered)
_CHUNK_ELEMS = 64 * 1024           # ~256 KiB f32 of live temporaries per chunk
_VMEM_LIMIT = 32 * 1024 * 1024     # legal on v5e (128 MiB), v6e (128), v7x (64)


def _round_up(x, m):
    return (x + m - 1) // m * m


def _make_kernel(rows, lanes, block_rows, chunk_rows, nblocks, needs_mask):
    """Focal-loss partial-reduction kernel with all statics baked in."""
    n_chunks = block_rows // chunk_rows
    last_block = nblocks - 1

    def kernel(pred_ref, gt_ref, out_ref):
        i = pl.program_id(0)

        @pl.when(i == 0)
        def _init():
            out_ref[...] = jnp.zeros_like(out_ref)

        def chunk_body(r0, masked):
            # Cast inside the kernel so bf16 inputs stream at half the bytes.
            p = pred_ref[pl.ds(r0, chunk_rows), :].astype(jnp.float32)
            g = gt_ref[pl.ds(r0, chunk_rows), :].astype(jnp.float32)
            if masked:
                # Rows at / beyond `rows` are the garbage tail of the boundary
                # block.  Replace them (before any math) with values that
                # contribute exactly zero and keep log() finite.
                row_ids = (last_block * block_rows + r0
                           + lax.broadcasted_iota(jnp.int32,
                                                  (chunk_rows, lanes), 0))
                valid = row_ids < rows
                p = jnp.where(valid, p, 0.5)
                g = jnp.where(valid, g, 2.0)

            pos = g == 1.0
            pos_f = pos.astype(jnp.float32)
            # gt == 1 -> pos branch; gt < 1 -> neg branch; gt > 1 (masked
            # padding) -> neither, so its contribution is exactly zero.
            ind = pos_f + (g < 1.0).astype(jnp.float32)

            one_m_p = 1.0 - p
            one_m_g = 1.0 - g
            sq_g = one_m_g * one_m_g                      # (1 - gt)^2
            # Single log per element: log(pred) on positives, log(1 - pred)
            # on negatives.  Avoids evaluating the irrelevant log entirely.
            x = jnp.where(pos, p, one_m_p)
            w = jnp.where(pos, one_m_p * one_m_p, (p * p) * (sq_g * sq_g))
            contrib = jnp.log(x) * w * ind

            # Fold row groups onto 8 sublanes (layout-preserving reshape,
            # pure VALU adds); the cross-sublane/lane reduce happens in JAX.
            out_ref[0, :, :] += contrib.reshape(-1, 8, lanes).sum(axis=0)
            out_ref[1, :, :] += pos_f.reshape(-1, 8, lanes).sum(axis=0)

        def accumulate(masked):
            if n_chunks == 1:
                chunk_body(0, masked)
            else:
                def body(s, carry):
                    chunk_body(pl.multiple_of(s * chunk_rows, chunk_rows),
                               masked)
                    return carry
                lax.fori_loop(0, n_chunks, body, 0)

        if needs_mask:
            # Interior blocks skip the iota + selects entirely.
            @pl.when(i != last_block)
            def _interior():
                accumulate(False)

            @pl.when(i == last_block)
            def _boundary():
                accumulate(True)
        else:
            accumulate(False)

    return kernel


@functools.partial(jax.jit, static_argnames=("block_bytes",))
def focal_loss(pred, gt, block_bytes=_BLOCK_BYTES):
    """CornerNet-style focal loss.  pred, gt: (B, C, H, W); pred in (0, 1)."""
    assert pred.shape == gt.shape
    lanes = pred.shape[-1] if pred.ndim >= 2 else pred.shape[0]
    rows = math.prod(pred.shape[:-1]) if pred.ndim >= 2 else 1

    # Layout-free collapse of the major dims (no relayout copy when H % 8 == 0
    # and no padding / dtype copies ever): W stays the lane dimension.
    pred2d = pred.reshape(rows, lanes)
    gt2d = gt.reshape(rows, lanes)

    lanes_padded = _round_up(max(lanes, 1), _LANE)
    row_bytes = lanes_padded * pred.dtype.itemsize

    # Chunk: ~64K padded elements of live temporaries, multiple of 32 rows
    # (satisfies f32/bf16 sublane tiling and keeps the 8-sublane fold exact).
    chunk_rows = min(max(32, (_CHUNK_ELEMS // lanes_padded) // 32 * 32),
                     max(32, _round_up(rows, 32)))
    # Block: as many whole chunks as the per-input byte budget allows, capped
    # at the smallest chunk multiple covering all rows.
    blocks_per_budget = max(1, block_bytes // (chunk_rows * row_bytes))
    block_rows = chunk_rows * min(blocks_per_budget,
                                  pl.cdiv(rows, chunk_rows))
    nblocks = pl.cdiv(rows, block_rows)
    needs_mask = (nblocks * block_rows) != rows

    kernel = _make_kernel(rows, lanes, block_rows, chunk_rows, nblocks,
                          needs_mask)

    sums = pl.pallas_call(
        kernel,
        out_shape=jax.ShapeDtypeStruct((2, 8, lanes), jnp.float32),
        grid=(nblocks,),
        in_specs=[
            pl.BlockSpec((block_rows, lanes), lambda i: (i, 0)),
            pl.BlockSpec((block_rows, lanes), lambda i: (i, 0)),
        ],
        out_specs=pl.BlockSpec((2, 8, lanes), lambda i: (0, 0, 0)),
        compiler_params=pltpu.CompilerParams(
            dimension_semantics=("arbitrary",),
            vmem_limit_bytes=_VMEM_LIMIT),
    )(pred2d, gt2d)

    total_loss = jnp.sum(sums[0])   # pos_loss + neg_loss
    num_pos = jnp.sum(sums[1])
    # pos_loss == 0 whenever num_pos == 0, so -total_loss == -neg_loss there.
    return jnp.where(num_pos == 0.0, -total_loss, -total_loss / num_pos)


def _focal_loss_ref(pred, gt):
    """Pure-JAX reference mirroring the PyTorch _neg_loss exactly."""
    pred = pred.astype(jnp.float32)
    gt = gt.astype(jnp.float32)
    pos_inds = (gt == 1.0).astype(jnp.float32)
    neg_inds = (gt < 1.0).astype(jnp.float32)
    neg_weights = (1.0 - gt) ** 4
    pos_loss = jnp.sum(jnp.log(pred) * (1.0 - pred) ** 2 * pos_inds)
    neg_loss = jnp.sum(jnp.log(1.0 - pred) * pred ** 2 * neg_weights * neg_inds)
    num_pos = jnp.sum(pos_inds)
    return jnp.where(num_pos == 0.0, -neg_loss,
                     -(pos_loss + neg_loss) / num_pos)


if __name__ == "__main__":
    root = jax.random.PRNGKey(0)

    def make_inputs(key, shape, with_peaks=True, dtype=jnp.float32):
        k_pred, k_gt, k_pos = jax.random.split(key, 3)
        # pred: strictly inside (0, 1) (stable under bf16 rounding too)
        p = 0.02 + 0.96 * jax.nn.sigmoid(
            jax.random.normal(k_pred, shape, jnp.float32))
        # gt: Gaussian-heatmap-like values in [0, 0.95) plus a few exact 1.0s
        g = jax.random.uniform(k_gt, shape, jnp.float32, 0.0, 0.95)
        if with_peaks:
            peak = jax.random.uniform(k_pos, shape) < 0.02
            g = jnp.where(peak, 1.0, g)
        return p.astype(dtype), g.astype(dtype)

    tests = [
        ((2, 4, 16, 16), jnp.float32, None),        # single block, single chunk
        ((4, 8, 96, 96), jnp.float32, None),        # non-128 lane dim, chunk loop
        ((2, 3, 50, 64), jnp.float32, None),        # ragged rows -> masked block
        ((4, 8, 100, 96), jnp.float32, 256 * 1024), # forced multi-block + mask
        ((2, 4, 16, 16), jnp.bfloat16, None),       # native bf16 streaming
    ]
    keys = jax.random.split(root, len(tests) + 1)

    for k, (shp, dt, bb) in zip(keys[:-1], tests):
        pred, gt = make_inputs(k, shp, with_peaks=True, dtype=dt)
        if bb is None:
            loss = focal_loss(pred, gt)
        else:
            loss = focal_loss(pred, gt, block_bytes=bb)
        jax.block_until_ready(loss)
        ref = _focal_loss_ref(pred, gt)
        tol = 2e-3 if dt == jnp.bfloat16 else 5e-4
        assert jnp.allclose(loss, ref, rtol=tol, atol=1e-5), (shp, dt, loss, ref)

    # num_pos == 0 branch (no gt == 1 anywhere)
    pred0, gt0 = make_inputs(keys[-1], (2, 4, 16, 16), with_peaks=False)
    loss0 = focal_loss(pred0, gt0)
    jax.block_until_ready(loss0)
    ref0 = _focal_loss_ref(pred0, gt0)
    assert jnp.allclose(loss0, ref0, rtol=5e-4, atol=1e-5), (loss0, ref0)

    print("KERNEL_OK")
</pallas_src>

<mosaic_0001>
module attributes {stable_mosaic.version = 11 : i64} {
  func.func @kernel(%arg0: i32, %arg1: memref<128x16xf32, #tpu.memory_space<vmem>>, %arg2: memref<128x16xf32, #tpu.memory_space<vmem>>, %arg3: memref<2x8x16xf32, #tpu.memory_space<vmem>>) attributes {dimension_semantics = [#tpu.dimension_semantics<arbitrary>], iteration_bounds = array<i64: 1>, scalar_prefetch = 0 : i64, scratch_operands = 0 : i64, tpu.core_type = #tpu.core_type<tc>, window_params = [{transform_indices = @transform_0, window_bounds = array<i64: 128, 16>}, {transform_indices = @transform_1, window_bounds = array<i64: 128, 16>}, {pipeline_mode = #tpu.pipeline_mode<synchronous>, transform_indices = @transform_2, window_bounds = array<i64: 2, 8, 16>}]} {
    %c0_i32 = arith.constant 0 : i32
    %0 = arith.cmpi eq, %arg0, %c0_i32 : i32
    %1 = arith.extui %0 : i1 to i32
    %c0_i32_0 = arith.constant 0 : i32
    %2 = arith.cmpi ne, %1, %c0_i32_0 : i32
    scf.if %2 {
      %cst_20 = arith.constant 0.000000e+00 : f32
      %44 = vector.broadcast %cst_20 : f32 to vector<2x8x16xf32>
      %c0_21 = arith.constant 0 : index
      %c0_22 = arith.constant 0 : index
      %c0_23 = arith.constant 0 : index
      %45 = vector.load %arg3[%c0_21, %c0_22, %c0_23] : memref<2x8x16xf32, #tpu.memory_space<vmem>>, vector<2x8x16xf32>
      tpu.vector_store %arg3[%c0_21, %c0_22, %c0_23], %44 {strides = array<i32>} : memref<2x8x16xf32, #tpu.memory_space<vmem>>, vector<2x8x16xf32>,
    } else {
    }
    %c0 = arith.constant 0 : index
    %c0_1 = arith.constant 0 : index
    %3 = vector.load %arg1[%c0, %c0_1] : memref<128x16xf32, #tpu.memory_space<vmem>>, vector<128x16xf32>
    %c0_2 = arith.constant 0 : index
    %c0_3 = arith.constant 0 : index
    %4 = vector.load %arg2[%c0_2, %c0_3] : memref<128x16xf32, #tpu.memory_space<vmem>>, vector<128x16xf32>
    %cst = arith.constant 1.000000e+00 : f32
    %5 = vector.broadcast %cst : f32 to vector<128x16xf32>
    %6 = arith.cmpf oeq, %4, %5 : vector<128x16xf32>
    %7 = arith.extui %6 : vector<128x16xi1> to vector<128x16xi32>
    %8 = arith.sitofp %7 : vector<128x16xi32> to vector<128x16xf32>
    %cst_4 = arith.constant 1.000000e+00 : f32
    %9 = vector.broadcast %cst_4 : f32 to vector<128x16xf32>
    %10 = arith.cmpf olt, %4, %9 : vector<128x16xf32>
    %11 = arith.extui %10 : vector<128x16xi1> to vector<128x16xi32>
    %12 = arith.sitofp %11 : vector<128x16xi32> to vector<128x16xf32>
    %13 = arith.addf %8, %12 : vector<128x16xf32>
    %cst_5 = arith.constant 1.000000e+00 : f32
    %14 = vector.broadcast %cst_5 : f32 to vector<128x16xf32>
    %15 = arith.subf %14, %3 : vector<128x16xf32>
    %cst_6 = arith.constant 1.000000e+00 : f32
    %16 = vector.broadcast %cst_6 : f32 to vector<128x16xf32>
    %17 = arith.subf %16, %4 : vector<128x16xf32>
    %18 = arith.mulf %17, %17 : vector<128x16xf32>
    %19 = arith.select %6, %3, %15 : vector<128x16xi1>, vector<128x16xf32>
    %20 = arith.mulf %15, %15 : vector<128x16xf32>
    %21 = arith.mulf %3, %3 : vector<128x16xf32>
    %22 = arith.mulf %18, %18 : vector<128x16xf32>
    %23 = arith.mulf %21, %22 : vector<128x16xf32>
    %24 = arith.select %6, %20, %23 : vector<128x16xi1>, vector<128x16xf32>
    %25 = math.log %19 : vector<128x16xf32>
    %26 = arith.mulf %25, %24 : vector<128x16xf32>
    %27 = arith.mulf %26, %13 : vector<128x16xf32>
    %c0_7 = arith.constant 0 : index
    %c0_8 = arith.constant 0 : index
    %c0_9 = arith.constant 0 : index
    %28 = vector.load %arg3[%c0_7, %c0_8, %c0_9] : memref<2x8x16xf32, #tpu.memory_space<vmem>>, vector<1x8x16xf32>
    %29 = vector.shape_cast %28 : vector<1x8x16xf32> to vector<8x16xf32>
    %30 = vector.shape_cast %27 : vector<128x16xf32> to vector<16x8x16xf32>
    %cst_10 = arith.constant dense<0.000000e+00> : vector<8x16xf32>
    %31 = vector.multi_reduction <add>, %30, %cst_10 [0] : vector<16x8x16xf32> to vector<8x16xf32>
    %32 = arith.addf %29, %31 : vector<8x16xf32>
    %c0_11 = arith.constant 0 : index
    %c0_12 = arith.constant 0 : index
    %c0_13 = arith.constant 0 : index
    %33 = vector.load %arg3[%c0_11, %c0_12, %c0_13] : memref<2x8x16xf32, #tpu.memory_space<vmem>>, vector<1x8x16xf32>
    %34 = vector.shape_cast %33 : vector<1x8x16xf32> to vector<8x16xf32>
    %35 = vector.shape_cast %32 : vector<8x16xf32> to vector<1x8x16xf32>
    tpu.vector_store %arg3[%c0_11, %c0_12, %c0_13], %35 {strides = array<i32>} : memref<2x8x16xf32, #tpu.memory_space<vmem>>, vector<1x8x16xf32>,
    %c1 = arith.constant 1 : index
    %c0_14 = arith.constant 0 : index
    %c0_15 = arith.constant 0 : index
    %36 = vector.load %arg3[%c1, %c0_14, %c0_15] : memref<2x8x16xf32, #tpu.memory_space<vmem>>, vector<1x8x16xf32>
    %37 = vector.shape_cast %36 : vector<1x8x16xf32> to vector<8x16xf32>
    %38 = vector.shape_cast %8 : vector<128x16xf32> to vector<16x8x16xf32>
    %cst_16 = arith.constant dense<0.000000e+00> : vector<8x16xf32>
    %39 = vector.multi_reduction <add>, %38, %cst_16 [0] : vector<16x8x16xf32> to vector<8x16xf32>
    %40 = arith.addf %37, %39 : vector<8x16xf32>
    %c1_17 = arith.constant 1 : index
    %c0_18 = arith.constant 0 : index
    %c0_19 = arith.constant 0 : index
    %41 = vector.load %arg3[%c1_17, %c0_18, %c0_19] : memref<2x8x16xf32, #tpu.memory_space<vmem>>, vector<1x8x16xf32>
    %42 = vector.shape_cast %41 : vector<1x8x16xf32> to vector<8x16xf32>
    %43 = vector.shape_cast %40 : vector<8x16xf32> to vector<1x8x16xf32>
    tpu.vector_store %arg3[%c1_17, %c0_18, %c0_19], %43 {strides = array<i32>} : memref<2x8x16xf32, #tpu.memory_space<vmem>>, vector<1x8x16xf32>,
    return
  }
  func.func @transform_0(%arg0: i32) -> (i32, i32) {
    %c0_i32 = arith.constant 0 : i32
    %c0_i32_0 = arith.constant 0 : i32
    return %arg0, %c0_i32 : i32, i32
  }
  func.func @transform_1(%arg0: i32) -> (i32, i32) {
    %c0_i32 = arith.constant 0 : i32
    %c0_i32_0 = arith.constant 0 : i32
    return %arg0, %c0_i32 : i32, i32
  }
  func.func @transform_2(%arg0: i32) -> (i32, i32, i32) {
    %c0_i32 = arith.constant 0 : i32
    %c0_i32_0 = arith.constant 0 : i32
    %c0_i32_1 = arith.constant 0 : i32
    %c0_i32_2 = arith.constant 0 : i32
    return %c0_i32, %c0_i32_0, %c0_i32_1 : i32, i32, i32
  }
}

</mosaic_0001>

<bundles_post_ra>
// kernel: focal_loss.1
= control target key start
LH: loop header
LB: loop body
LE: loop exit
PB: predicated region body
PF: predicated region fallthrough
CT: control target
= control target key end

     0   :  { %7 = vsyncpa [#allocation3], 0  ;;  %s1332_s0 = inlined_call_operand.hbm [shape: f32[128,16], index: 0, kind: input, shape index: {}]   ;;  %s1333_s1 = inlined_call_operand.hbm [shape: f32[128,16], index: 1, kind: input, shape index: {}]   ;;  %s1334_s2 = inlined_call_operand.vmem [shape: f32[2,8,16], index: 2, kind: output, shape index: {}]  }
   0x1   :  { %8 = vsyncpa [#allocation5], 0  ;;  %s589_s9 = smov [#allocation2]  }
   0x2   :  { %s14_s10 = sshll.u32 %s589_s9, 4  ;;  %s15_s10 = int_to_ptr.vmem [resolvable:$true] %s14_s10 }
   0x3   :  { %s553_s11 = scalar_lea.vmem %s15_s10, 2048  ;;  %p558_p1 = scmp.lt.s32.totalorder %s15_s10, %s15_s10 }
   0x4   :  { %p554_p0 = scmp.ne.s32.totalorder %s15_s10, %s553_s11  ;;  %p559_p2 = scmp.lt.s32.totalorder %s553_s11, %s553_s11 }
   0x6   :  { %p560_p3 = por %p559_p2, %p558_p1 }
   0x8   :  { %p561_p4 = pnand %p560_p3, %p554_p0 }
   0xa   :  { %564 = shalt.err (!%p561_p4)
}
   0xb   :  { %s590_s12 = smov 128   ;;  %s591_s13 = smov 8  }
   0xc   :  { %20 = dma.hbm_to_vmem [thread:$0]  %s1332_s0, 2048, %s15_s10, [#allocation3], %s590_s12, %s590_s12, %s591_s13  }
   0xd   :  { %s592_s16 = smov [#allocation4]  }
   0xe   :  { %s26_s17 = sshll.u32 %s592_s16, 4  ;;  %s27_s17 = int_to_ptr.vmem [resolvable:$true] %s26_s17 }
   0xf   :  { %s573_s18 = scalar_lea.vmem %s27_s17, 2048  ;;  %p578_p6 = scmp.lt.s32.totalorder %s27_s17, %s27_s17 }
  0x10   :  { %p574_p5 = scmp.ne.s32.totalorder %s27_s17, %s573_s18  ;;  %p579_p7 = scmp.lt.s32.totalorder %s573_s18, %s573_s18 }
  0x12   :  { %p580_p8 = por %p579_p7, %p578_p6 }
  0x14   :  { %p581_p9 = pnand %p580_p8, %p574_p5 }
  0x16   :  { %584 = shalt.err (!%p581_p9)
}
  0x17   :  { %32 = dma.hbm_to_vmem [thread:$0]  %s1333_s1, 2048, %s27_s17, [#allocation5], %s590_s12, %s590_s12, %s591_s13  }
  0x18   :  { %585 = dma.done.wait [#allocation3], 2048  }
  0x19   :  { %586 = vsyncadd [#allocation3], 4294965248 }
  0x1a   :  { %587 = dma.done.wait [#allocation5], 2048  }
  0x1b   :  { %588 = vsyncadd [#allocation5], 4294965248  ;;  %vm1335_vm0 = vcmask 130048   ;;  %v593_v0 = vmov 0.0   ;;  %v46_v1 = vld [vmem:[#allocation2] sm:$0xff]  ;;  %v625_v2 = vld [vmem:[#allocation2 + $0x8] sm:$0xff] }
  0x1c   :  { %44 = vst.msk [vmem:[%s1334_s2] sm:$0xff] %vm1335_vm0, %v593_v0  ;;  %45 = vst.msk [vmem:[%s1334_s2 + $0x8] sm:$0xff] %vm1335_vm0, %v593_v0  ;;  %v627_v3 = vld [vmem:[#allocation2 + $0x10] sm:$0xff]  ;;  %v629_v4 = vld [vmem:[#allocation2 + $0x18] sm:$0xff]  ;;  %v190_v14 = vsub.f32 1.0, %v46_v1  ;;  %v191_v15 = vsub.f32 1.0, %v625_v2  ;;  %v651_v17 = vmul.f32 %v46_v1, %v46_v1  ;;  %v670_v24 = vmul.f32 %v625_v2, %v625_v2 }
  0x1d   :  { %1397 = vst [vmem:[#allocation8_spill] sm:$0xff] %v627_v3  ;;  %v631_v5 = vld [vmem:[#allocation2 + $0x20] sm:$0xff]  ;;  %v633_v6 = vld [vmem:[#allocation2 + $0x28] sm:$0xff]  ;;  %v635_v7 = vld [vmem:[#allocation2 + $0x30] sm:$0xff]  ;;  %v192_v16 = vsub.f32 1.0, %v627_v3  ;;  %v660_v21 = vsub.f32 1.0, %v629_v4 }
  0x1e   :  { %v637_v8 = vld [vmem:[#allocation2 + $0x38] sm:$0xff]  ;;  %v639_v9 = vld [vmem:[#allocation2 + $0x40] sm:$0xff]  ;;  %v641_v10 = vld [vmem:[#allocation2 + $0x48] sm:$0xff]  ;;  %1402 = vst [vmem:[#allocation13_spill] sm:$0xff] %v651_v17  ;;  %v663_v22 = vsub.f32 1.0, %v631_v5  ;;  %v666_v23 = vsub.f32 1.0, %v633_v6  ;;  %v701_v36 = vmul.f32 %v190_v14, %v190_v14  ;;  %v716_v42 = vmul.f32 %v191_v15, %v191_v15 }
  0x1f   :  { %1398 = vst [vmem:[#allocation9_spill] sm:$0xff] %v641_v10  ;;  %v643_v11 = vld [vmem:[#allocation2 + $0x50] sm:$0xff]  ;;  %v645_v12 = vld [vmem:[#allocation2 + $0x58] sm:$0xff]  ;;  %v647_v13 = vld [vmem:[#allocation4] sm:$0xff]  ;;  %v677_v27 = vsub.f32 1.0, %v635_v7  ;;  %v680_v28 = vsub.f32 1.0, %v637_v8  ;;  %v728_v47 = vmul.f32 %v192_v16, %v192_v16  ;;  %v732_v48 = vmul.f32 %v660_v21, %v660_v21 }
  0x20   :  { %1399 = vst [vmem:[#allocation10_spill] sm:$0xff] %v643_v11  ;;  %1400 = vst [vmem:[#allocation11_spill] sm:$0xff] %v645_v12  ;;  %v653_v18 = vld [vmem:[#allocation2 + $0x60] sm:$0xff]  ;;  %v655_v19 = vld [vmem:[#allocation2 + $0x68] sm:$0xff]  ;;  %v683_v29 = vsub.f32 1.0, %v639_v9  ;;  %v686_v30 = vsub.f32 1.0, %v641_v10 }
  0x21   :  { %1401 = vst [vmem:[#allocation12_spill] sm:$0xff] %v647_v13  ;;  %1403 = vst [vmem:[#allocation14_spill] sm:$0xff] %v653_v18  ;;  %v657_v20 = vld [vmem:[#allocation4 + $0x8] sm:$0xff]  ;;  %v672_v25 = vld [vmem:[#allocation2 + $0x70] sm:$0xff]  ;;  %vm1338_vm1 = vcmp.eq.f32.partialorder %v647_v13, 1.0  ;;  %v696_v34 = vsub.f32 1.0, %v643_v11 }
  0x22   :  { %1404 = vst [vmem:[#allocation15_spill] sm:$0xff] %v655_v19  ;;  %1405 = vst [vmem:[#allocation16_spill] sm:$0xff] %v657_v20  ;;  %v674_v26 = vld [vmem:[#allocation4 + $0x10] sm:$0xff]  ;;  %v688_v31 = vld [vmem:[#allocation4 + $0x18] sm:$0xff]  ;;  %v699_v35 = vsub.f32 1.0, %v645_v12  ;;  %vm1337_vm2 = vcmp.eq.f32.partialorder %v657_v20, 1.0  ;;  %v746_v52 = vsel %vm1338_vm1, %v46_v1, %v190_v14 }
  0x23   :  { %1406 = vst [vmem:[#allocation17_spill] sm:$0xff] %v670_v24  ;;  %1407 = vst [vmem:[#allocation18_spill] sm:$0xff] %v672_v25  ;;  %v690_v32 = vld [vmem:[#allocation4 + $0x20] sm:$0xff]  ;;  %v692_v33 = vld [vmem:[#allocation4 + $0x28] sm:$0xff]  ;;  %v711_v40 = vsub.f32 1.0, %v653_v18  ;;  %v714_v41 = vsub.f32 1.0, %v655_v19  ;;  %v756_v54 = vsel %vm1337_vm2, %v625_v2, %v191_v15 }
  0x24   :  { %1408 = vst [vmem:[#allocation19_spill] sm:$0xff] %v674_v26  ;;  %1409 = vst [vmem:[#allocation20_spill] sm:$0xff] %v686_v30  ;;  %v703_v37 = vld [vmem:[#allocation4 + $0x30] sm:$0xff]  ;;  %v705_v38 = vld [vmem:[#allocation4 + $0x38] sm:$0xff]  ;;  %vm1336_vm3 = vcmp.eq.f32.partialorder %v674_v26, 1.0  ;;  %v726_v46 = vsub.f32 1.0, %v672_v25 }
  0x25   :  { %1410 = vst [vmem:[#allocation21_spill] sm:$0xff] %v688_v31  ;;  %1411 = vst [vmem:[#allocation22_spill] sm:$0xff] %v690_v32  ;;  %v707_v39 = vld [vmem:[#allocation4 + $0x40] sm:$0xff]  ;;  %v718_v43 = vld [vmem:[#allocation4 + $0x48] sm:$0xff]  ;;  %vm1351_vm4 = vcmp.eq.f32.partialorder %v688_v31, 1.0  ;;  %vm1350_vm5 = vcmp.eq.f32.partialorder %v690_v32, 1.0  ;;  %v764_v55 = vsel %vm1336_vm3, %v627_v3, %v192_v16 }
  0x26   :  { %1412 = vst [vmem:[#allocation23_spill] sm:$0xff] %v692_v33  ;;  %1413 = vst [vmem:[#allocation24_spill] sm:$0xff] %v696_v34  ;;  %v720_v44 = vld [vmem:[#allocation4 + $0x50] sm:$0xff]  ;;  %v722_v45 = vld [vmem:[#allocation4 + $0x58] sm:$0xff]  ;;  %vm1349_vm6 = vcmp.eq.f32.partialorder %v692_v33, 1.0  ;;  %vm1348_vm8 = vcmp.eq.f32.partialorder %v703_v37, 1.0 }
  0x27   :  { %1414 = vst [vmem:[#allocation25_spill] sm:$0xff] %v699_v35  ;;  %1415 = vst [vmem:[#allocation26_spill] sm:$0xff] %v701_v36  ;;  %v734_v49 = vld [vmem:[#allocation4 + $0x60] sm:$0xff]  ;;  %v736_v50 = vld [vmem:[#allocation4 + $0x68] sm:$0xff]  ;;  %vm1347_vm9 = vcmp.eq.f32.partialorder %v705_v38, 1.0  ;;  %vm1346_vm10 = vcmp.eq.f32.partialorder %v707_v39, 1.0 }
  0x28   :  { %1416 = vst [vmem:[#allocation27_spill] sm:$0xff] %v703_v37  ;;  %1417 = vst [vmem:[#allocation28_spill] sm:$0xff] %v705_v38  ;;  %v738_v51 = vld [vmem:[#allocation4 + $0x70] sm:$0xff]  ;;  %v748_v53 = vld [vmem:[#allocation4 + $0x78] sm:$0xff]  ;;  %vm1344_vm11 = vcmp.eq.f32.partialorder %v718_v43, 1.0  ;;  %vm1343_vm12 = vcmp.eq.f32.partialorder %v720_v44, 1.0 }
  0x29   :  { %1418 = vst [vmem:[#allocation29_spill] sm:$0xff] %v707_v39  ;;  %1419 = vst [vmem:[#allocation30_spill] sm:$0xff] %v711_v40  ;;  %vm1341_vm13 = vcmp.eq.f32.partialorder %v722_v45, 1.0  ;;  %vm1339_vm14 = vcmp.eq.f32.partialorder %v734_v49, 1.0  ;;  %vm1340_vm15 = vcmp.eq.f32.partialorder %v736_v50, 1.0  ;;  %vm1342_vm0 = vcmp.eq.f32.partialorder %v738_v51, 1.0 }
  0x2a   :  { %1420 = vst [vmem:[#allocation31_spill] sm:$0xff] %v714_v41  ;;  %1421 = vst [vmem:[#allocation32_spill] sm:$0xff] %v716_v42  ;;  %v772_v56 = vsel %vm1338_vm1, 1.0, %v593_v0  ;;  %vm1345_vm7 = vcmp.eq.f32.partialorder %v748_v53, 1.0  ;;  %v778_v57 = vsel %vm1337_vm2, 1.0, %v593_v0  ;;  %v783_v58 = vsel %vm1336_vm3, 1.0, %v593_v0 }
  0x2b   :  { %1422 = vst [vmem:[#allocation33_spill] sm:$0xff] %v718_v43  ;;  %1423 = vst [vmem:[#allocation34_spill] sm:$0xff] %v720_v44  ;;  %v788_v59 = vsel %vm1351_vm4, 1.0, %v593_v0  ;;  %v793_v60 = vsel %vm1350_vm5, 1.0, %v593_v0  ;;  %v798_v61 = vsel %vm1349_vm6, 1.0, %v593_v0  ;;  %v803_v62 = vsel %vm1348_vm8, 1.0, %v593_v0 }
  0x2c   :  { %1424 = vst [vmem:[#allocation35_spill] sm:$0xff] %v722_v45  ;;  %1425 = vst [vmem:[#allocation36_spill] sm:$0xff] %v726_v46  ;;  %v808_v63 = vsel %vm1347_vm9, 1.0, %v593_v0  ;;  %v813_v1 = vsel %vm1346_vm10, 1.0, %v593_v0  ;;  %v818_v2 = vsel %vm1344_vm11, 1.0, %v593_v0  ;;  %v823_v14 = vsel %vm1343_vm12, 1.0, %v593_v0 }
  0x2d   :  { %1426 = vst [vmem:[#allocation37_spill] sm:$0xff] %v728_v47  ;;  %1427 = vst [vmem:[#allocation38_spill] sm:$0xff] %v732_v48  ;;  %v828_v15 = vsel %vm1341_vm13, 1.0, %v593_v0  ;;  %v833_v16 = vsel %vm1339_vm14, 1.0, %v593_v0  ;;  %v838_v48 = vsel %vm1340_vm15, 1.0, %v593_v0  ;;  %v843_v47 = vsel %vm1342_vm0, 1.0, %v593_v0 }
  0x2e   :  { %1428 = vst [vmem:[#allocation39_spill] sm:$0xff] %v734_v49  ;;  %1429 = vst [vmem:[#allocation40_spill] sm:$0xff] %v736_v50  ;;  %v848_v42 = vsel %vm1345_vm7, 1.0, %v593_v0  ;;  %vm127_vm3 = vcmp.lt.f32.partialorder %v657_v20, 1.0  ;;  %vm128_vm2 = vcmp.lt.f32.partialorder %v674_v26, 1.0  ;;  %vm129_vm1 = vcmp.lt.f32.partialorder %v688_v31, 1.0 }
  0x2f   :  { %1430 = vst [vmem:[#allocation41_spill] sm:$0xff] %v738_v51  ;;  %1431 = vst [vmem:[#allocation42_spill] sm:$0xff] %v746_v52  ;;  %vm130_vm14 = vcmp.lt.f32.partialorder %v690_v32, 1.0  ;;  %vm131_vm15 = vcmp.lt.f32.partialorder %v692_v33, 1.0  ;;  %vm132_vm13 = vcmp.lt.f32.partialorder %v703_v37, 1.0  ;;  %vm133_vm0 = vcmp.lt.f32.partialorder %v705_v38, 1.0 }
  0x30   :  { %1432 = vst [vmem:[#allocation43_spill] sm:$0xff] %v748_v53  ;;  %1433 = vst [vmem:[#allocation44_spill] sm:$0xff] %v756_v54  ;;  %vm134_vm12 = vcmp.lt.f32.partialorder %v707_v39, 1.0  ;;  %vm135_vm11 = vcmp.lt.f32.partialorder %v718_v43, 1.0  ;;  %vm136_vm7 = vcmp.lt.f32.partialorder %v720_v44, 1.0  ;;  %vm137_vm10 = vcmp.lt.f32.partialorder %v722_v45, 1.0 }
  0x31   :  { %1434 = vst [vmem:[#allocation45_spill] sm:$0xff] %v764_v55  ;;  %1435 = vst [vmem:[#allocation46_spill] sm:$0xff] %v803_v62  ;;  %vm138_vm9 = vcmp.lt.f32.partialorder %v734_v49, 1.0  ;;  %vm139_vm8 = vcmp.lt.f32.partialorder %v736_v50, 1.0  ;;  %vm140_vm6 = vcmp.lt.f32.partialorder %v738_v51, 1.0  ;;  %vm141_vm5 = vcmp.lt.f32.partialorder %v748_v53, 1.0 }
  0x32   :  { %1436 = vst [vmem:[#allocation47_spill] sm:$0xff] %v808_v63  ;;  %1437 = vst [vmem:[#allocation48_spill] sm:$0xff] %v813_v1  ;;  %vm1445_vm4 = vcmp.lt.f32.partialorder %v647_v13, 1.0  ;;  %v492_v36 = vsel %vm128_vm2, 1.0, %v593_v0  ;;  %v493_v24 = vsel %vm129_vm1, 1.0, %v593_v0  ;;  %v494_v17 = vsel %vm130_vm14, 1.0, %v593_v0 }
  0x33   :  { %1438 = vst [vmem:[#allocation49_spill] sm:$0xff] %v818_v2  ;;  %1439 = vst [vmem:[#allocation50_spill] sm:$0xff] %v823_v14  ;;  %v495_v55 = vsel %vm131_vm15, 1.0, %v593_v0  ;;  %v496_v54 = vsel %vm132_vm13, 1.0, %v593_v0  ;;  %v497_v52 = vsel %vm133_vm0, 1.0, %v593_v0  ;;  %v498_v3 = vsel %vm134_vm12, 1.0, %v593_v0 }
  0x34   :  { %1440 = vst [vmem:[#allocation51_spill] sm:$0xff] %v828_v15  ;;  %1441 = vst [vmem:[#allocation52_spill] sm:$0xff] %v833_v16  ;;  %v499_v25 = vsel %vm135_vm11, 1.0, %v593_v0  ;;  %v500_v46 = vsel %vm136_vm7, 1.0, %v593_v0  ;;  %v501_v19 = vsel %vm137_vm10, 1.0, %v593_v0  ;;  %v502_v41 = vsel %vm138_vm9, 1.0, %v593_v0 }
  0x35   :  { %1442 = vst [vmem:[#allocation53_spill] sm:$0xff] %v838_v48  ;;  %1443 = vst [vmem:[#allocation54_spill] sm:$0xff] %v843_v47  ;;  %v491_v47 = vsel %vm127_vm3, 1.0, %v593_v0  ;;  %v503_v18 = vsel %vm139_vm8, 1.0, %v593_v0  ;;  %v910_v40 = vsel %vm140_vm6, 1.0, %v593_v0  ;;  %v915_v12 = vsel %vm141_vm5, 1.0, %v593_v0 }
  0x36   :  { %1444 = vst [vmem:[#allocation55_spill] sm:$0xff] %v848_v42  ;;  %v490_v42 = vsel %vm1445_vm4, 1.0, %v593_v0  ;;  %1446 = vst [vmem:[#allocation56_spill] sm:$0xff] %v910_v40  ;;  %v920_v11 = vld [vmem:[#allocation2 + $0x78] sm:$0xff]  ;;  %v923_v34 = vadd.f32 %v491_v47, %v778_v57  ;;  %v926_v10 = vadd.f32 %v492_v36, %v783_v58  ;;  %v929_v30 = vadd.f32 %v493_v24, %v788_v59 }
  0x37   :  { %1447 = vst [vmem:[#allocation57_spill] sm:$0xff] %v915_v12  ;;  %v918_v35 = vadd.f32 %v490_v42, %v772_v56  ;;  %v932_v40 = vadd.f32 %v494_v17, %v793_v60  ;;  %v935_v0 = vadd.f32 %v495_v55, %v798_v61  ;;  %v938_v42 = vadd.f32 %v496_v54, %v803_v62 }
  0x38   :  { %1449 = vst [vmem:[#allocation59_spill] sm:$0xff] %v923_v34  ;;  %1450 = vst [vmem:[#allocation60_spill] sm:$0xff] %v926_v10  ;;  %v941_v12 = vadd.f32 %v497_v52, %v808_v63  ;;  %v944_v47 = vadd.f32 %v498_v3, %v813_v1  ;;  %v947_v36 = vadd.f32 %v499_v25, %v818_v2  ;;  %v205_v52 = vsub.f32 1.0, %v920_v11 }
  0x39   :  { %1448 = vst [vmem:[#allocation58_spill] sm:$0xff] %v918_v35  ;;  %1451 = vst [vmem:[#allocation61_spill] sm:$0xff] %v929_v30  ;;  %v950_v24 = vadd.f32 %v500_v46, %v823_v14  ;;  %v953_v17 = vadd.f32 %v501_v19, %v828_v15  ;;  %v956_v55 = vadd.f32 %v502_v41, %v833_v16  ;;  %v206_v3 = vsub.f32 1.0, %v647_v13 }
  0x3a   :  { %1452 = vst [vmem:[#allocation62_spill] sm:$0xff] %v932_v40  ;;  %1453 = vst [vmem:[#allocation63_spill] sm:$0xff] %v935_v0  ;;  %v959_v54 = vadd.f32 %v503_v18, %v838_v48  ;;  %v208_v25 = vsub.f32 1.0, %v674_v26  ;;  %v209_v46 = vsub.f32 1.0, %v688_v31  ;;  %v211_v19 = vsub.f32 1.0, %v692_v33 }
  0x3b   :  { %1454 = vst [vmem:[#allocation64_spill] sm:$0xff] %v938_v42  ;;  %1455 = vst [vmem:[#allocation65_spill] sm:$0xff] %v941_v12  ;;  %v212_v41 = vsub.f32 1.0, %v703_v37  ;;  %v214_v18 = vsub.f32 1.0, %v707_v39  ;;  %v217_v48 = vsub.f32 1.0, %v722_v45  ;;  %v218_v16 = vsub.f32 1.0, %v734_v49 }
  0x3c   :  { %1456 = vst [vmem:[#allocation66_spill] sm:$0xff] %v944_v47  ;;  %1457 = vst [vmem:[#allocation67_spill] sm:$0xff] %v947_v36  ;;  %v207_v47 = vsub.f32 1.0, %v657_v20  ;;  %v219_v36 = vsub.f32 1.0, %v736_v50  ;;  %v220_v15 = vsub.f32 1.0, %v738_v51  ;;  %v221_v12 = vsub.f32 1.0, %v748_v53 }
  0x3d   :  { %1458 = vst [vmem:[#allocation68_spill] sm:$0xff] %v950_v24  ;;  %1459 = vst [vmem:[#allocation69_spill] sm:$0xff] %v953_v17  ;;  %v210_v24 = vsub.f32 1.0, %v690_v32  ;;  %v216_v17 = vsub.f32 1.0, %v720_v44  ;;  %v222_v14 = vmul.f32 %v206_v3, %v206_v3  ;;  %v224_v0 = vmul.f32 %v208_v25, %v208_v25  ;;  %v1472_v25 = vld [vmem:[#allocation10_spill] sm:$0xff] }
  0x3e   :  { %1460 = vst [vmem:[#allocation70_spill] sm:$0xff] %v956_v55  ;;  %1461 = vst [vmem:[#allocation71_spill] sm:$0xff] %v959_v54  ;;  %v213_v55 = vsub.f32 1.0, %v705_v38  ;;  %v215_v54 = vsub.f32 1.0, %v718_v43  ;;  %v223_v42 = vmul.f32 %v207_v47, %v207_v47  ;;  %v225_v40 = vmul.f32 %v209_v46, %v209_v46 }
  0x3f   :  { %v226_v30 = vmul.f32 %v210_v24, %v210_v24  ;;  %v227_v10 = vmul.f32 %v211_v19, %v211_v19  ;;  %v228_v34 = vmul.f32 %v212_v41, %v212_v41  ;;  %v980_v2 = vmul.f32 %v214_v18, %v214_v18  ;;  %v1474_v19 = vld [vmem:[#allocation25_spill] sm:$0xff]  ;;  %v1475_v41 = vld [vmem:[#allocation11_spill] sm:$0xff] }
  0x40   :  { %v978_v35 = vmul.f32 %v213_v55, %v213_v55  ;;  %v982_v1 = vmul.f32 %v215_v54, %v215_v54  ;;  %v984_v63 = vmul.f32 %v216_v17, %v216_v17  ;;  %v986_v26 = vmul.f32 %v217_v48, %v217_v48  ;;  %v1471_v54 = vld [vmem:[#allocation24_spill] sm:$0xff] }
  0x41   :  { %v988_v20 = vmul.f32 %v218_v16, %v218_v16  ;;  %v990_v13 = vmul.f32 %v219_v36, %v219_v36  ;;  %v992_v47 = vmul.f32 %v220_v15, %v220_v15  ;;  %v994_v3 = vmul.f32 %v221_v12, %v221_v12  ;;  %v1468_v16 = vld [vmem:[#allocation20_spill] sm:$0xff]  ;;  %v1469_v36 = vld [vmem:[#allocation9_spill] sm:$0xff] }
  0x42   :  { %vm1462_vm0 = vcmp.eq.f32.partialorder %v688_v31, 1.0  ;;  %vm1463_vm1 = vcmp.eq.f32.partialorder %v690_v32, 1.0  ;;  %vm1464_vm2 = vcmp.eq.f32.partialorder %v692_v33, 1.0  ;;  %vm1465_vm3 = vcmp.eq.f32.partialorder %v703_v37, 1.0  ;;  %v1481_v33 = vld [vmem:[#allocation15_spill] sm:$0xff]  ;;  %v1485_v31 = vld [vmem:[#allocation18_spill] sm:$0xff] }
  0x43   :  { %v241_v24 = vsel %vm1462_vm0, %v629_v4, %v660_v21  ;;  %v242_v17 = vsel %vm1463_vm1, %v631_v5, %v663_v22  ;;  %v243_v48 = vsel %vm1464_vm2, %v633_v6, %v666_v23  ;;  %v1012_v12 = vsel %vm1465_vm3, %v635_v7, %v677_v27 }
  0x44   :  { %vm1466_vm4 = vcmp.eq.f32.partialorder %v705_v38, 1.0  ;;  %vm1467_vm5 = vcmp.eq.f32.partialorder %v707_v39, 1.0  ;;  %vm1470_vm6 = vcmp.eq.f32.partialorder %v718_v43, 1.0  ;;  %vm1473_vm7 = vcmp.eq.f32.partialorder %v720_v44, 1.0  ;;  %v1477_v39 = vld [vmem:[#allocation30_spill] sm:$0xff]  ;;  %v1480_v43 = vld [vmem:[#allocation31_spill] sm:$0xff] }
  0x45   :  { %v1018_v21 = vsel %vm1466_vm4, %v637_v8, %v680_v28  ;;  %v1024_v15 = vsel %vm1467_vm5, %v639_v9, %v683_v29  ;;  %v1030_v55 = vsel %vm1470_vm6, %v1469_v36, %v1468_v16  ;;  %v1036_v46 = vsel %vm1473_vm7, %v1472_v25, %v1471_v54  ;;  %v1478_v38 = vld [vmem:[#allocation14_spill] sm:$0xff]  ;;  %v1484_v44 = vld [vmem:[#allocation36_spill] sm:$0xff] }
  0x46   :  { %vm1476_vm8 = vcmp.eq.f32.partialorder %v722_v45, 1.0  ;;  %vm1479_vm9 = vcmp.eq.f32.partialorder %v734_v49, 1.0  ;;  %vm1482_vm10 = vcmp.eq.f32.partialorder %v736_v50, 1.0  ;;  %vm1486_vm11 = vcmp.eq.f32.partialorder %v738_v51, 1.0 }
  0x47   :  { %v1042_v18 = vsel %vm1476_vm8, %v1475_v41, %v1474_v19  ;;  %v1048_v37 = vsel %vm1479_vm9, %v1478_v38, %v1477_v39  ;;  %v1054_v32 = vsel %vm1482_vm10, %v1481_v33, %v1480_v43  ;;  %v1060_v62 = vsel %vm1486_vm11, %v1485_v31, %v1484_v44 }
  0x48   :  { %1483 = vst [vmem:[#allocation20_spill] sm:$0xff] %v1054_v32  ;;  %vm1487_vm12 = vcmp.eq.f32.partialorder %v748_v53, 1.0  ;;  %v1069_v49 = vmul.f32 %v663_v22, %v663_v22  ;;  %v1073_v50 = vmul.f32 %v666_v23, %v666_v23  ;;  %v1077_v32 = vmul.f32 %v677_v27, %v677_v27 }
  0x49   :  { %v1065_v45 = vsel %vm1487_vm12, %v920_v11, %v205_v52  ;;  %v1081_v51 = vmul.f32 %v680_v28, %v680_v28  ;;  %v1085_v53 = vmul.f32 %v683_v29, %v683_v29  ;;  %v1089_v22 = vmul.f32 %v1468_v16, %v1468_v16 }
  0x4a   :  { %v1093_v23 = vmul.f32 %v1471_v54, %v1471_v54  ;;  %v1097_v27 = vmul.f32 %v1474_v19, %v1474_v19  ;;  %v1101_v28 = vmul.f32 %v1477_v39, %v1477_v39  ;;  %v1105_v29 = vmul.f32 %v1480_v43, %v1480_v43  ;;  %v1495_v54 = vld [vmem:[#allocation8_spill] sm:$0xff] }
  0x4b   :  { %1488 = vst [vmem:[#allocation9_spill] sm:$0xff] %v1089_v22  ;;  %v1109_v16 = vmul.f32 %v1484_v44, %v1484_v44  ;;  %v1111_v22 = vmul.f32 %v205_v52, %v205_v52  ;;  %v273_v19 = vmul.f32 %v629_v4, %v629_v4  ;;  %v274_v39 = vmul.f32 %v631_v5, %v631_v5 }
  0x4c   :  { %1489 = vst [vmem:[#allocation24_spill] sm:$0xff] %v1093_v23  ;;  %1490 = vst [vmem:[#allocation10_spill] sm:$0xff] %v1097_v27  ;;  %v272_v23 = vmul.f32 %v1495_v54, %v1495_v54  ;;  %v276_v43 = vmul.f32 %v635_v7, %v635_v7  ;;  %v277_v44 = vmul.f32 %v637_v8, %v637_v8  ;;  %vm1498_vm13 = vcmask 130048   ;;  %v1501_v27 = vld [vmem:[#allocation44_spill] sm:$0xff] }
  0x4d   :  { %1491 = vst [vmem:[#allocation25_spill] sm:$0xff] %v1101_v28  ;;  %1492 = vst [vmem:[#allocation11_spill] sm:$0xff] %v1105_v29  ;;  %v275_v28 = vmul.f32 %v633_v6, %v633_v6  ;;  %v278_v52 = vmul.f32 %v639_v9, %v639_v9  ;;  %v279_v54 = vmul.f32 %v1469_v36, %v1469_v36 }
  0x4e   :  { %1493 = vst [vmem:[#allocation30_spill] sm:$0xff] %v1109_v16  ;;  %1494 = vst [vmem:[#allocation14_spill] sm:$0xff] %v1111_v22  ;;  %v280_v4 = vmul.f32 %v1472_v25, %v1472_v25  ;;  %v281_v5 = vmul.f32 %v1475_v41, %v1475_v41  ;;  %v282_v6 = vmul.f32 %v1478_v38, %v1478_v38  ;;  %v1497_v16 = vld [vmem:[#allocation42_spill] sm:$0xff]  ;;  %v435_v38 = vsel %vm1498_vm13, %v772_v56, 0.0 }
  0x4f   :  { %v1137_v7 = vmul.f32 %v1481_v33, %v1481_v33  ;;  %v1141_v8 = vmul.f32 %v1485_v31, %v1485_v31  ;;  %v1145_v9 = vmul.f32 %v920_v11, %v920_v11  ;;  %v286_v36 = vmul.f32 %v222_v14, %v222_v14  ;;  %vm1499_vm14 = vmmov %vm1498_vm13 }
  0x50   :  { %v287_v25 = vmul.f32 %v223_v42, %v223_v42  ;;  %v288_v22 = vmul.f32 %v224_v0, %v224_v0  ;;  %513 = vlog2.f32 %v1497_v16  ;;  %v436_v33 = vsel %vm1499_vm14, %v778_v57, 0.0  ;;  %vm1500_vm15 = vmmov %vm1498_vm13  ;;  %v1502_v42 = vld [vmem:[#allocation45_spill] sm:$0xff] }
  0x51   :  { %1496 = vst [vmem:[#allocation31_spill] sm:$0xff] %v1145_v9  ;;  %v438_v41 = vsel %vm1500_vm15, %v783_v58, 0.0  ;;  %v289_v31 = vmul.f32 %v225_v40, %v225_v40  ;;  %v290_v29 = vmul.f32 %v226_v30, %v226_v30  ;;  %515 = vlog2.f32 %v1501_v27  ;;  %vm1503_vm0 = vmmov %vm1498_vm13 }
  0x52   :  { %v437_v11 = vadd.f32 %v436_v33, %v435_v38  ;;  %v291_v9 = vmul.f32 %v227_v10, %v227_v10  ;;  %v292_v14 = vmul.f32 %v228_v34, %v228_v34  ;;  %517 = vlog2.f32 %v1502_v42  ;;  %vm1504_vm1 = vmmov %vm1503_vm0 }
  0x53   :  { %v440_v0 = vsel %vm1503_vm0, %v788_v59, 0.0  ;;  %v293_v56 = vmul.f32 %v978_v35, %v978_v35  ;;  %v294_v57 = vmul.f32 %v980_v2, %v980_v2  ;;  %519 = vlog2.f32 %v241_v24  ;;  %vm1506_vm2 = vmmov %vm1503_vm0 }
  0x54   :  { %v439_v58 = vadd.f32 %v438_v41, %v437_v11  ;;  %v295_v30 = vmul.f32 %v982_v1, %v982_v1  ;;  %v296_v10 = vmul.f32 %v984_v63, %v984_v63  ;;  %521 = vlog2.f32 %v242_v17  ;;  %vm1509_vm3 = vmmov %vm1503_vm0  ;;  %v1524_v41 = vld [vmem:[#allocation23_spill] sm:$0xff] }
  0x55   :  { %v442_v34 = vsel %vm1504_vm1, %v793_v60, 0.0  ;;  %v297_v40 = vmul.f32 %v986_v26, %v986_v26  ;;  %v298_v35 = vmul.f32 %v988_v20, %v988_v20  ;;  %523 = vlog2.f32 %v243_v48  ;;  %v1505_v26 = vld [vmem:[#allocation13_spill] sm:$0xff]  ;;  %v1526_v11 = vld [vmem:[#allocation27_spill] sm:$0xff]  ;;  %vm1532_vm12 = vmmov %vm1503_vm0 }
  0x56   :  { %v441_v59 = vadd.f32 %v440_v0, %v439_v58  ;;  %v1174_v2 = vmul.f32 %v990_v13, %v990_v13  ;;  %v1178_v1 = vmul.f32 %v992_v47, %v992_v47  ;;  %v1182_v63 = vmul.f32 %v994_v3, %v994_v3  ;;  %v1507_v13 = vld [vmem:[#allocation17_spill] sm:$0xff]  ;;  %vm1536_vm14 = vmmov %vm1503_vm0 }
  0x57   :  { %525 = vlog2.f32 %v1012_v12  ;;  %v302_v60 = vmul.f32 %v286_v36, %v1505_v26  ;;  %v444_v24 = vsel %vm1506_vm2, %v798_v61, 0.0  ;;  %v303_v17 = vmul.f32 %v287_v25, %v1507_v13  ;;  %v1508_v61 = vld [vmem:[#allocation46_spill] sm:$0xff]  ;;  %vm1538_vm15 = vmmov %vm1503_vm0 }
  0x58   :  { %527 = vlog2.f32 %v1018_v21  ;;  %v443_v20 = vadd.f32 %v442_v34, %v441_v59  ;;  %v304_v48 = vmul.f32 %v288_v22, %v272_v23  ;;  %v305_v27 = vmul.f32 %v289_v31, %v273_v19  ;;  %v1513_v19 = vld [vmem:[#allocation32_spill] sm:$0xff]  ;;  %vm1543_vm1 = vmmov %vm1503_vm0 }
  0x59   :  { %529 = vlog2.f32 %v1024_v15  ;;  %v306_v47 = vmul.f32 %v290_v29, %v274_v39  ;;  %v307_v16 = vmul.f32 %v291_v9, %v275_v28  ;;  %v308_v3 = vmul.f32 %v292_v14, %v276_v43  ;;  %v1510_v28 = vld [vmem:[#allocation26_spill] sm:$0xff]  ;;  %v1535_v59 = vld [vmem:[#allocation48_spill] sm:$0xff]  ;;  %vm1545_vm2 = vmmov %vm1503_vm0 }
  0x5a   :  { %531 = vlog2.f32 %v1030_v55  ;;  %v309_v12 = vmul.f32 %v293_v56, %v277_v44  ;;  %v310_v38 = vmul.f32 %v294_v57, %v278_v52  ;;  %v445_v21 = vadd.f32 %v444_v24, %v443_v20  ;;  %v1511_v55 = vld [vmem:[#allocation12_spill] sm:$0xff]  ;;  %v1516_v44 = vld [vmem:[#allocation37_spill] sm:$0xff]  ;;  %v1517_v52 = vld [vmem:[#allocation19_spill] sm:$0xff] }
  0x5b   :  { %533 = vlog2.f32 %v1036_v46  ;;  %v1193_v36 = vmul.f32 %v295_v30, %v279_v54  ;;  %v1195_v33 = vmul.f32 %v296_v10, %v280_v4  ;;  %v446_v22 = vsel %vm1509_vm3, %v1508_v61, 0.0  ;;  %v1514_v46 = vld [vmem:[#allocation16_spill] sm:$0xff]  ;;  %v1519_v54 = vld [vmem:[#allocation38_spill] sm:$0xff]  ;;  %v1520_v4 = vld [vmem:[#allocation21_spill] sm:$0xff] }
  0x5c   :  { %535 = vlog2.f32 %v1042_v18  ;;  %v1200_v15 = vmul.f32 %v297_v40, %v281_v5  ;;  %v1202_v23 = vmul.f32 %v298_v35, %v282_v6  ;;  %vm1512_vm4 = vcmp.eq.f32.partialorder %v1511_v55, 1.0  ;;  %v1522_v6 = vld [vmem:[#allocation22_spill] sm:$0xff]  ;;  %v1528_v57 = vld [vmem:[#allocation28_spill] sm:$0xff]  ;;  %v1537_v24 = vld [vmem:[#allocation49_spill] sm:$0xff] }
  0x5d   :  { %v318_v29 = vsel %vm1512_vm4, %v1510_v28, %v302_v60  ;;  %vm1515_vm5 = vcmp.eq.f32.partialorder %v1514_v46, 1.0  ;;  %v514_v43 = vpop.eup %513  ;;  %vm1518_vm6 = vcmp.eq.f32.partialorder %v1517_v52, 1.0  ;;  %vm1521_vm7 = vcmp.eq.f32.partialorder %v1520_v4, 1.0  ;;  %v1541_v55 = vld [vmem:[#allocation60_spill] sm:$0xff] }
  0x5e   :  { %v319_v39 = vsel %vm1515_vm5, %v1513_v19, %v303_v17  ;;  %v320_v18 = vsel %vm1518_vm6, %v1516_v44, %v304_v48  ;;  %v321_v5 = vsel %vm1521_vm7, %v1519_v54, %v305_v27  ;;  %vm1523_vm8 = vcmp.eq.f32.partialorder %v1522_v6, 1.0  ;;  %v516_v25 = vpop.eup %515  ;;  %v1542_v44 = vld [vmem:[#allocation61_spill] sm:$0xff]  ;;  %vm1553_vm5 = vmmov %vm1503_vm0 }
  0x5f   :  { %v322_v9 = vsel %vm1523_vm8, %v1069_v49, %v306_v47  ;;  %537 = vlog2.f32 %v1048_v37  ;;  %vm1525_vm9 = vcmp.eq.f32.partialorder %v1524_v41, 1.0  ;;  %vm1527_vm10 = vcmp.eq.f32.partialorder %v1526_v11, 1.0  ;;  %v518_v56 = vpop.eup %517  ;;  %v1530_v49 = vld [vmem:[#allocation20_spill] sm:$0xff]  ;;  %v1531_v37 = vld [vmem:[#allocation47_spill] sm:$0xff]  ;;  %v1539_v47 = vld [vmem:[#allocation58_spill] sm:$0xff] }
  0x60   :  { %v323_v31 = vsel %vm1525_vm9, %v1073_v50, %v307_v16  ;;  %v324_v14 = vsel %vm1527_vm10, %v1077_v32, %v308_v3  ;;  %v335_v42 = vmul.f32 0.6931472, %v514_v43  ;;  %v447_v0 = vadd.f32 %v446_v22, %v445_v21  ;;  %v520_v34 = vpop.eup %519  ;;  %v1533_v50 = vld [vmem:[#allocation29_spill] sm:$0xff]  ;;  %v1540_v21 = vld [vmem:[#allocation59_spill] sm:$0xff]  ;;  %vm1556_vm6 = vmmov %vm1503_vm0 }
  0x61   :  { %vm1529_vm11 = vcmp.eq.f32.partialorder %v1528_v57, 1.0  ;;  %v337_v30 = vmul.f32 0.6931472, %v516_v25  ;;  %539 = vlog2.f32 %v1530_v49  ;;  %v448_v10 = vsel %vm1532_vm12, %v1531_v37, 0.0  ;;  %v522_v60 = vpop.eup %521  ;;  %v1546_v57 = vld [vmem:[#allocation9_spill] sm:$0xff]  ;;  %v1550_v37 = vld [vmem:[#allocation34_spill] sm:$0xff]  ;;  %vm1558_vm7 = vmmov %vm1503_vm0 }
  0x62   :  { %v325_v58 = vsel %vm1529_vm11, %v1081_v51, %v309_v12  ;;  %vm1534_vm13 = vcmp.eq.f32.partialorder %v1533_v50, 1.0  ;;  %v339_v35 = vmul.f32 0.6931472, %v518_v56  ;;  %v366_v32 = vmul.f32 %v335_v42, %v318_v29  ;;  %v524_v17 = vpop.eup %523  ;;  %vm1566_vm10 = vmmov %vm1503_vm0 }
  0x63   :  { %v326_v40 = vsel %vm1534_vm13, %v1085_v53, %v310_v38  ;;  %v450_v26 = vsel %vm1536_vm14, %v1535_v59, 0.0  ;;  %v341_v20 = vmul.f32 0.6931472, %v520_v34  ;;  %541 = vlog2.f32 %v1060_v62  ;;  %vm1567_vm11 = vmmov %vm1503_vm0 }
  0x64   :  { %v367_v51 = vmul.f32 %v337_v30, %v319_v39  ;;  %v452_v13 = vsel %vm1538_vm15, %v1537_v24, 0.0  ;;  %v343_v48 = vmul.f32 0.6931472, %v522_v60  ;;  %v368_v27 = vmul.f32 %v339_v35, %v320_v18  ;;  %v526_v53 = vpop.eup %525  ;;  %v1547_v30 = vld [vmem:[#allocation33_spill] sm:$0xff]  ;;  %v1552_v35 = vld [vmem:[#allocation63_spill] sm:$0xff]  ;;  %v1554_v60 = vld [vmem:[#allocation64_spill] sm:$0xff] }
  0x65   :  { %v382_v16 = vmul.f32 %v366_v32, %v1539_v47  ;;  %v449_v3 = vadd.f32 %v448_v10, %v447_v0  ;;  %v345_v12 = vmul.f32 0.6931472, %v524_v17  ;;  %543 = vlog2.f32 %v1065_v45  ;;  %v528_v22 = vpop.eup %527  ;;  %vm1569_vm12 = vmmov %vm1503_vm0 }
  0x66   :  { %v369_v38 = vmul.f32 %v341_v20, %v321_v5  ;;  %v383_v61 = vmul.f32 %v367_v51, %v1540_v21  ;;  %v347_v28 = vmul.f32 0.6931472, %v526_v53  ;;  %v370_v62 = vmul.f32 %v343_v48, %v322_v9  ;;  %v530_v46 = vpop.eup %529  ;;  %v1544_v9 = vld [vmem:[#allocation62_spill] sm:$0xff]  ;;  %v1557_v48 = vld [vmem:[#allocation65_spill] sm:$0xff]  ;;  %vm1571_vm13 = vmmov %vm1503_vm0 }
  0x67   :  { %v384_v29 = vmul.f32 %v368_v27, %v1541_v55  ;;  %v400_v19 = vsel %vm1503_vm0, %v382_v16, 0.0  ;;  %v349_v39 = vmul.f32 0.6931472, %v528_v22  ;;  %v371_v43 = vmul.f32 %v345_v12, %v323_v31  ;;  %v532_v54 = vpop.eup %531  ;;  %v1555_v51 = vld [vmem:[#allocation50_spill] sm:$0xff]  ;;  %v1563_v12 = vld [vmem:[#allocation39_spill] sm:$0xff]  ;;  %vm1577_vm15 = vmmov %vm1503_vm0 }
  0x68   :  { %v385_v52 = vmul.f32 %v369_v38, %v1542_v44  ;;  %v401_v18 = vsel %vm1543_vm1, %v383_v61, 0.0  ;;  %v351_v4 = vmul.f32 0.6931472, %v530_v46  ;;  %v372_v45 = vmul.f32 %v347_v28, %v324_v14  ;;  %v534_v25 = vpop.eup %533  ;;  %v1549_v14 = vld [vmem:[#allocation24_spill] sm:$0xff]  ;;  %v1559_v16 = vld [vmem:[#allocation10_spill] sm:$0xff]  ;;  %v1568_v46 = vld [vmem:[#allocation51_spill] sm:$0xff] }
  0x69   :  { %v402_v5 = vadd.f32 %v401_v18, %v400_v19  ;;  %v451_v6 = vadd.f32 %v450_v26, %v449_v3  ;;  %v353_v41 = vmul.f32 0.6931472, %v532_v54  ;;  %v373_v11 = vmul.f32 %v349_v39, %v325_v58  ;;  %v536_v56 = vpop.eup %535  ;;  %v1560_v3 = vld [vmem:[#allocation35_spill] sm:$0xff]  ;;  %v1565_v28 = vld [vmem:[#allocation66_spill] sm:$0xff] }
  0x6a   :  { %v386_v42 = vmul.f32 %v370_v62, %v1544_v9  ;;  %v403_v0 = vsel %vm1545_vm2, %v384_v29, 0.0  ;;  %v315_v31 = vmul.f32 %v1174_v2, %v1137_v7  ;;  %vm1548_vm3 = vcmp.eq.f32.partialorder %v1547_v30, 1.0  ;;  %v1570_v44 = vld [vmem:[#allocation67_spill] sm:$0xff]  ;;  %v1579_v30 = vld [vmem:[#allocation30_spill] sm:$0xff]  ;;  %vm1583_vm2 = vmmov %vm1503_vm0 }
  0x6b   :  { %v327_v49 = vsel %vm1548_vm3, %v1546_v57, %v1193_v36  ;;  %vm1551_vm4 = vcmp.eq.f32.partialorder %v1550_v37, 1.0  ;;  %v404_v34 = vadd.f32 %v403_v0, %v402_v5  ;;  %v355_v58 = vmul.f32 0.6931472, %v534_v25  ;;  %v1572_v54 = vld [vmem:[#allocation31_spill] sm:$0xff]  ;;  %v1574_v5 = vld [vmem:[#allocation40_spill] sm:$0xff]  ;;  %vm1585_vm3 = vmmov %vm1503_vm0 }
  0x6c   :  { %v328_v10 = vsel %vm1551_vm4, %v1549_v14, %v1195_v33  ;;  %v374_v50 = vmul.f32 %v351_v4, %v326_v40  ;;  %v387_v32 = vmul.f32 %v371_v43, %v1552_v35  ;;  %v405_v59 = vsel %vm1553_vm5, %v385_v52, 0.0  ;;  %v538_v26 = vpop.eup %537  ;;  %v1578_v0 = vld [vmem:[#allocation68_spill] sm:$0xff]  ;;  %vm1592_vm5 = vmmov %vm1503_vm0 }
  0x6d   :  { %v388_v7 = vmul.f32 %v372_v45, %v1554_v60  ;;  %v406_v2 = vadd.f32 %v405_v59, %v404_v34  ;;  %v453_v20 = vadd.f32 %v452_v13, %v451_v6  ;;  %v454_v36 = vsel %vm1556_vm6, %v1555_v51, 0.0  ;;  %v1562_v13 = vld [vmem:[#allocation25_spill] sm:$0xff]  ;;  %v1573_v45 = vld [vmem:[#allocation11_spill] sm:$0xff]  ;;  %v1586_v59 = vld [vmem:[#allocation54_spill] sm:$0xff] }
  0x6e   :  { %v357_v24 = vmul.f32 0.6931472, %v536_v56  ;;  %v375_v17 = vmul.f32 %v353_v41, %v327_v49  ;;  %v389_v27 = vmul.f32 %v373_v11, %v1557_v48  ;;  %v407_v33 = vsel %vm1558_vm7, %v386_v42, 0.0  ;;  %v540_v47 = vpop.eup %539  ;;  %v1576_v41 = vld [vmem:[#allocation52_spill] sm:$0xff]  ;;  %v1580_v49 = vld [vmem:[#allocation41_spill] sm:$0xff]  ;;  %vm1593_vm6 = vmmov %vm1503_vm0 }
  0x6f   :  { %v316_v40 = vmul.f32 %v1178_v1, %v1141_v8  ;;  %vm1561_vm8 = vcmp.eq.f32.partialorder %v1560_v3, 1.0  ;;  %vm1564_vm9 = vcmp.eq.f32.partialorder %v1563_v12, 1.0  ;;  %v408_v21 = vadd.f32 %v407_v33, %v406_v2  ;;  %v1589_v2 = vld [vmem:[#allocation43_spill] sm:$0xff]  ;;  %vm1597_vm7 = vmmov %vm1503_vm0 }
  0x70   :  { %v329_v53 = vsel %vm1561_vm8, %v1559_v16, %v1200_v15  ;;  %v330_v38 = vsel %vm1564_vm9, %v1562_v13, %v1202_v23  ;;  %v359_v61 = vmul.f32 0.6931472, %v538_v26  ;;  %v376_v22 = vmul.f32 %v355_v58, %v328_v10  ;;  %v542_v29 = vpop.eup %541  ;;  %v1582_v10 = vld [vmem:[#allocation53_spill] sm:$0xff]  ;;  %v1587_v26 = vld [vmem:[#allocation56_spill] sm:$0xff]  ;;  %v1596_v12 = vld [vmem:[#allocation71_spill] sm:$0xff] }
  0x71   :  { %v390_v62 = vmul.f32 %v374_v50, %v1565_v28  ;;  %v409_v55 = vsel %vm1566_vm10, %v387_v32, 0.0  ;;  %v411_v8 = vsel %vm1567_vm11, %v388_v7, 0.0  ;;  %v455_v1 = vadd.f32 %v454_v36, %v453_v20  ;;  %v1584_v50 = vld [vmem:[#allocation69_spill] sm:$0xff]  ;;  %v1588_v7 = vld [vmem:[#allocation14_spill] sm:$0xff]  ;;  %vm1598_vm8 = vmmov %vm1503_vm0 }
  0x72   :  { %v410_v19 = vadd.f32 %v409_v55, %v408_v21  ;;  %v456_v15 = vsel %vm1569_vm12, %v1568_v46, 0.0  ;;  %v361_v39 = vmul.f32 0.6931472, %v540_v47  ;;  %v377_v43 = vmul.f32 %v357_v24, %v329_v53  ;;  %v544_v18 = vpop.eup %543  ;;  %v1594_v47 = vld [vmem:[#allocation55_spill] sm:$0xff]  ;;  %vm1599_vm9 = vmmov %vm1503_vm0 }
  0x73   :  { %v391_v52 = vmul.f32 %v375_v17, %v1570_v44  ;;  %v413_v23 = vsel %vm1571_vm13, %v389_v27, 0.0  ;;  %v317_v4 = vmul.f32 %v1182_v63, %v1572_v54  ;;  %vm1575_vm14 = vcmp.eq.f32.partialorder %v1574_v5, 1.0  ;;  %v1591_v17 = vld [vmem:[#allocation70_spill] sm:$0xff]  ;;  %vm1600_vm10 = vmmov %vm1503_vm0 }
  0x74   :  { %v331_v6 = vsel %vm1575_vm14, %v1573_v45, %v315_v31  ;;  %v412_v25 = vadd.f32 %v411_v8, %v410_v19  ;;  %v458_v11 = vsel %vm1577_vm15, %v1576_v41, 0.0  ;;  %v363_v9 = vmul.f32 0.6931472, %v542_v29  ;;  %v506_v29 = vld [vmem:[%s1334_s2 + $0x8] sm:$0xff]  ;;  %vm1601_vm11 = vmmov %vm1503_vm0 }
  0x75   :  { %v378_v42 = vmul.f32 %v359_v61, %v330_v38  ;;  %v392_v56 = vmul.f32 %v376_v22, %v1578_v0  ;;  %v415_v57 = vsel %vm1503_vm0, %v390_v62, 0.0  ;;  %vm1581_vm1 = vcmp.eq.f32.partialorder %v1580_v49, 1.0  ;;  %vm1602_vm12 = vmmov %vm1503_vm0 }
  0x76   :  { %v332_v14 = vsel %vm1581_vm1, %v1579_v30, %v316_v40  ;;  %v414_v37 = vadd.f32 %v413_v23, %v412_v25  ;;  %v457_v63 = vadd.f32 %v456_v15, %v455_v1  ;;  %v460_v34 = vsel %vm1583_vm2, %v1582_v10, 0.0  ;;  %v1595_v40 = vld [vmem:[#allocation57_spill] sm:$0xff]  ;;  %vm1603_vm13 = vmmov %vm1503_vm0 }
  0x77   :  { %v365_v31 = vmul.f32 0.6931472, %v544_v18  ;;  %v379_v58 = vmul.f32 %v361_v39, %v331_v6  ;;  %v393_v35 = vmul.f32 %v377_v43, %v1584_v50  ;;  %v417_v32 = vsel %vm1585_vm3, %v391_v52, 0.0  ;;  %v398_v18 = vld [vmem:[%s1334_s2] sm:$0xff]  ;;  %vm1604_vm14 = vmmov %vm1503_vm0 }
  0x78   :  { %v188_v60 = vadd.f32 %v1587_v26, %v1586_v59  ;;  %vm1590_vm4 = vcmp.eq.f32.partialorder %v1589_v2, 1.0  ;;  %v416_v51 = vadd.f32 %v415_v57, %v414_v37  ;;  %v459_v36 = vadd.f32 %v458_v11, %v457_v63 }
  0x79   :  { %v333_v20 = vsel %vm1590_vm4, %v1588_v7, %v317_v4  ;;  %v380_v24 = vmul.f32 %v363_v9, %v332_v14  ;;  %v394_v48 = vmul.f32 %v378_v42, %v1591_v17  ;;  %v419_v27 = vsel %vm1592_vm5, %v392_v56, 0.0 }
  0x7a   :  { %v462_v33 = vsel %vm1593_vm6, %v1586_v59, 0.0  ;;  %v189_v16 = vadd.f32 %v1595_v40, %v1594_v47  ;;  %v418_v3 = vadd.f32 %v417_v32, %v416_v51  ;;  %v461_v53 = vadd.f32 %v460_v34, %v459_v36 }
  0x7b   :  { %v381_v13 = vmul.f32 %v365_v31, %v333_v20  ;;  %v395_v38 = vmul.f32 %v379_v58, %v1596_v12  ;;  %v421_v21 = vsel %vm1597_vm7, %v393_v35, 0.0  ;;  %v464_v61 = vsel %vm1598_vm8, %v1594_v47, 0.0 }
  0x7c   :  { %v420_v22 = vadd.f32 %v419_v27, %v418_v3  ;;  %v463_v28 = vadd.f32 %v462_v33, %v461_v53  ;;  %v396_v62 = vmul.f32 %v380_v24, %v188_v60  ;;  %v423_v55 = vsel %vm1599_vm9, %v394_v48, 0.0 }
  0x7d   :  { %v397_v1 = vmul.f32 %v381_v13, %v189_v16  ;;  %v425_v46 = vsel %vm1600_vm10, %v395_v38, 0.0 }
  0x7e   :  { %v422_v19 = vadd.f32 %v421_v21, %v420_v22  ;;  %v465_v8 = vadd.f32 %v464_v61, %v463_v28  ;;  %v427_v43 = vsel %vm1601_vm11, %v396_v62, 0.0 }
  0x7f   :  { %v429_v52 = vsel %vm1603_vm13, %v397_v1, 0.0 }
  0x80   :  { %v424_v15 = vadd.f32 %v423_v55, %v422_v19  ;;  %v466_v39 = vadd.f32 %v506_v29, %v465_v8 }
  0x82   :  { %v426_v44 = vadd.f32 %v425_v46, %v424_v15  ;;  %507 = vst.msk [vmem:[%s1334_s2 + $0x8] sm:$0xff] %vm1602_vm12, %v466_v39 }
  0x84   :  { %v428_v23 = vadd.f32 %v427_v43, %v426_v44 }
  0x86   :  { %v430_v54 = vadd.f32 %v429_v52, %v428_v23 }
  0x88   :  { %v431_v4 = vadd.f32 %v430_v54, %v398_v18 }
  0x8a   :  { %432 = vst.msk [vmem:[%s1334_s2] sm:$0xff] %vm1604_vm14, %v431_v4 }
  0x8b   :  { %472 = vsyncpa [#allocation3], 1 }
  0x8c   :  { %473 = vsyncpa [#allocation5], 1 }

</bundles_post_ra>
